<compile_context>
chip_gen: v7x
topology: tpu7x:2x2x1
jax: 0.10.0
libtpu: 0.0.40
codegen_flags: <defaults>
</compile_context>

<pallas_src>
import jax
import jax.numpy as jnp
from jax.experimental import pallas as pl
from jax.experimental.pallas import tpu as pltpu

D_IN = 300
D_OUT = 100

_TILE_N = 4096  # batch tile for the streamed (large-N) path


def _linear_kernel(x_ref, w_ref, b_ref, o_ref):
    # MXU matmul with f32 accumulation + fused bias add; one store per tile.
    acc = jnp.dot(x_ref[...], w_ref[...], preferred_element_type=jnp.float32)
    o_ref[...] = (acc + b_ref[...].astype(jnp.float32)).astype(o_ref.dtype)


def prepare_params(w, b, *, use_bf16=False):
    """One-time parameter prep (hoisted out of the forward path).

    w: [D_out, D_in] (PyTorch nn.Linear layout), b: [D_out]
    returns (w_t [D_in, D_out], b_row [1, D_out])
    """
    w_t = jnp.asarray(w).T
    b_row = jnp.asarray(b).reshape(1, -1).astype(jnp.float32)
    if use_bf16:
        w_t = w_t.astype(jnp.bfloat16)
    return w_t, b_row


def word_vec_dim_reduction(x, w_t, b_row, *, use_bf16=False):
    """Forward pass: returns x @ w_t + b_row  (== x @ W^T + b), shape [N, D_out]."""
    n, d_in = x.shape
    d_in2, d_out = w_t.shape
    assert d_in == d_in2 and b_row.shape == (1, d_out)

    if use_bf16:
        x = x.astype(jnp.bfloat16)

    out_shape = jax.ShapeDtypeStruct((n, d_out), jnp.float32)

    if n <= _TILE_N:
        # --- small-batch path: grid-less, everything resident in VMEM ---
        return pl.pallas_call(
            _linear_kernel,
            out_shape=out_shape,
            in_specs=[
                pl.BlockSpec(memory_space=pltpu.MemorySpace.VMEM),
                pl.BlockSpec(memory_space=pltpu.MemorySpace.VMEM),
                pl.BlockSpec(memory_space=pltpu.MemorySpace.VMEM),
            ],
            out_specs=pl.BlockSpec(memory_space=pltpu.MemorySpace.VMEM),
        )(x, w_t, b_row)

    # --- large-batch path: stream x/out over N; weight & bias stay resident ---
    return pl.pallas_call(
        _linear_kernel,
        out_shape=out_shape,
        grid_spec=pltpu.PrefetchScalarGridSpec(
            num_scalar_prefetch=0,
            grid=(pl.cdiv(n, _TILE_N),),  # partial boundary tile allowed
            in_specs=[
                pl.BlockSpec((_TILE_N, d_in), lambda i: (i, 0)),
                pl.BlockSpec((d_in, d_out), lambda i: (0, 0)),
                pl.BlockSpec((1, d_out), lambda i: (0, 0)),
            ],
            out_specs=pl.BlockSpec((_TILE_N, d_out), lambda i: (i, 0)),
        ),
        compiler_params=pltpu.CompilerParams(
            # "parallel" lets v7x shard the N axis across its 2 TensorCores.
            dimension_semantics=("parallel",),
            # Per-step VMEM: x 4.7 MB + out 1.6 MB, double-buffered ~12.5 MB
            # + resident weight/bias ~0.12 MB -> under every chip's 32 MiB
            # scoped default, so no vmem_limit_bytes override is needed.
        ),
    )(x, w_t, b_row)


if __name__ == "__main__":
    input_dimension = D_IN
    output_dimension = D_OUT

    key = jax.random.PRNGKey(0)
    kx, kw, kb, kx2 = jax.random.split(key, 4)

    # Deterministic parameter init (mimics nn.Linear's uniform(-1/sqrt(in), 1/sqrt(in))).
    bound = 1.0 / jnp.sqrt(jnp.float32(input_dimension))
    w = jax.random.uniform(
        kw, (output_dimension, input_dimension), jnp.float32, -bound, bound
    )
    b = jax.random.uniform(kb, (output_dimension,), jnp.float32, -bound, bound)

    w_t, b_row = prepare_params(w, b)

    # 1) Small batch (grid-less, fully VMEM-resident path).
    batch = 2
    x = jax.random.normal(kx, (batch, input_dimension), jnp.float32)
    out = jax.block_until_ready(word_vec_dim_reduction(x, w_t, b_row))
    ref = x @ w.T + b
    assert out.shape == (batch, output_dimension)
    assert jnp.allclose(out, ref, atol=1e-5, rtol=1e-5)

    # 2) Large batch (N-streamed grid path with a partial boundary tile: 4096 + 4 rows).
    big_batch = _TILE_N + 4
    x_big = jax.random.normal(kx2, (big_batch, input_dimension), jnp.float32)
    out_big = jax.block_until_ready(word_vec_dim_reduction(x_big, w_t, b_row))
    ref_big = x_big @ w.T + b
    assert out_big.shape == (big_batch, output_dimension)
    assert jnp.allclose(out_big, ref_big, atol=1e-4, rtol=1e-4)

    # 3) Optional bf16-streaming variant (halves HBM bytes; looser numerics).
    w_t_bf, b_row_bf = prepare_params(w, b, use_bf16=True)
    out_bf = jax.block_until_ready(
        word_vec_dim_reduction(x, w_t_bf, b_row_bf, use_bf16=True)
    )
    assert out_bf.shape == (batch, output_dimension)
    assert jnp.allclose(out_bf, ref, atol=5e-2, rtol=5e-2)

    print("KERNEL_OK")
</pallas_src>

<mosaic_0001>
module attributes {stable_mosaic.version = 11 : i64} {
  func.func @_linear_kernel(%arg0: memref<2x300xf32, #tpu.memory_space<vmem>>, %arg1: memref<300x100xf32, #tpu.memory_space<vmem>>, %arg2: memref<1x100xf32, #tpu.memory_space<vmem>>, %arg3: memref<2x100xf32, #tpu.memory_space<vmem>>) attributes {dimension_semantics = [], scalar_prefetch = 0 : i64, scratch_operands = 0 : i64, tpu.core_type = #tpu.core_type<tc>} {
    %c0 = arith.constant 0 : index
    %c0_0 = arith.constant 0 : index
    %0 = vector.load %arg0[%c0, %c0_0] : memref<2x300xf32, #tpu.memory_space<vmem>>, vector<2x300xf32>
    %c0_1 = arith.constant 0 : index
    %c0_2 = arith.constant 0 : index
    %1 = vector.load %arg1[%c0_1, %c0_2] : memref<300x100xf32, #tpu.memory_space<vmem>>, vector<300x100xf32>
    %cst = arith.constant dense<0.000000e+00> : vector<2x100xf32>
    %2 = tpu.matmul %0, %1, %cst {dimension_numbers = #tpu.dot_dimension_numbers<[1], [0], [0], [1], [0, 0, 1, 1], [], []>} : vector<2x300xf32>, vector<300x100xf32>, vector<2x100xf32> -> vector<2x100xf32>
    %c0_3 = arith.constant 0 : index
    %c0_4 = arith.constant 0 : index
    %3 = vector.load %arg2[%c0_3, %c0_4] : memref<1x100xf32, #tpu.memory_space<vmem>>, vector<1x100xf32>
    %4 = vector.broadcast %3 : vector<1x100xf32> to vector<2x100xf32>
    %5 = arith.addf %2, %4 : vector<2x100xf32>
    %c0_5 = arith.constant 0 : index
    %c0_6 = arith.constant 0 : index
    %6 = vector.load %arg3[%c0_5, %c0_6] : memref<2x100xf32, #tpu.memory_space<vmem>>, vector<2x100xf32>
    tpu.vector_store %arg3[%c0_5, %c0_6], %5 {strides = array<i32>} : memref<2x100xf32, #tpu.memory_space<vmem>>, vector<2x100xf32>,
    return
  }
}

</mosaic_0001>

<bundles_post_ra>
// kernel: tpu_custom_call.1
= control target key start
LH: loop header
LB: loop body
LE: loop exit
PB: predicated region body
PF: predicated region fallthrough
CT: control target
= control target key end

     0   :  { %8 = vsyncpa [#allocation3], 0  ;;  %s535_s0 = inlined_call_operand.hbm [shape: f32[2,300], index: 0, kind: input, shape index: {}]   ;;  %s536_s1 = inlined_call_operand.hbm [shape: f32[300,100], index: 1, kind: input, shape index: {}]   ;;  %s537_s2 = inlined_call_operand.vmem [shape: f32[1,100], index: 2, kind: input, shape index: {}]   ;;  %s538_s3 = inlined_call_operand.hbm [shape: f32[2,100], index: 3, kind: output, shape index: {}]  }
   0x1   :  { %9 = vsyncpa [#allocation6], 0 }
   0x2   :  { %10 = vsyncpa [#allocation4], 0  ;;  %s456_s12 = smov [#allocation2]   ;;  %s457_s14 = smov [#allocation5]  }
   0x3   :  { %s17_s13 = sshll.u32 %s456_s12, 4  ;;  %s26_s15 = sshll.u32 %s457_s14, 4  ;;  %s18_s13 = int_to_ptr.vmem [resolvable:$true] %s17_s13  ;;  %s486_s15 = int_to_ptr.vmem [resolvable:$true] %s26_s15 }
   0x4   :  { %s384_s18 = scalar_lea.hbm %s535_s0, 96 }
   0x5   :  { %p385_p0 = scmp.ne.s32.totalorder %s535_s0, %s384_s18  ;;  %p388_p1 = scmp.lt.u32.totalorder %s384_s18, %s535_s0 }
   0x7   :  { %p390_p2 = pnand %p388_p1, %p385_p0 }
   0x9   :  { %393 = shalt.err (!%p390_p2)
}
   0xa   :  { %s394_s23 = scalar_lea.vmem %s18_s13, 96  ;;  %p399_p4 = scmp.lt.s32.totalorder %s18_s13, %s18_s13 }
   0xb   :  { %p395_p3 = scmp.ne.s32.totalorder %s18_s13, %s394_s23  ;;  %p400_p5 = scmp.lt.s32.totalorder %s394_s23, %s394_s23 }
   0xd   :  { %p401_p6 = por %p400_p5, %p399_p4 }
   0xf   :  { %p402_p7 = pnand %p401_p6, %p395_p3 }
  0x11   :  { %405 = shalt.err (!%p402_p7)
}
  0x12   :  { %20 = dma.hbm_to_vmem [thread:$0]  %s535_s0, 96, %s18_s13, [#allocation3]  }
  0x13   :  { %s406_s28 = scalar_lea.hbm %s536_s1, 4864 }
  0x14   :  { %p407_p8 = scmp.ne.s32.totalorder %s536_s1, %s406_s28  ;;  %p410_p9 = scmp.lt.u32.totalorder %s406_s28, %s536_s1 }
  0x16   :  { %p412_p10 = pnand %p410_p9, %p407_p8 }
  0x18   :  { %415 = shalt.err (!%p412_p10)
}
  0x19   :  { %s416_s6 = scalar_lea.vmem %s486_s15, 4864  ;;  %p421_p12 = scmp.lt.s32.totalorder %s486_s15, %s486_s15 }
  0x1a   :  { %p417_p11 = scmp.ne.s32.totalorder %s486_s15, %s416_s6  ;;  %p422_p13 = scmp.lt.s32.totalorder %s416_s6, %s416_s6 }
  0x1c   :  { %p423_p0 = por %p422_p13, %p421_p12 }
  0x1e   :  { %p424_p1 = pnand %p423_p0, %p417_p11 }
  0x20   :  { %427 = shalt.err (!%p424_p1)
}
  0x21   :  { %s458_s0 = smov 128   ;;  %s459_s7 = smov 8  }
  0x22   :  { %32 = dma.hbm_to_vmem [thread:$0]  %s536_s1, 4864, %s486_s15, [#allocation6], %s458_s0, %s458_s0, %s459_s7  }
  0x23   :  { %450 = dma.done.wait [#allocation3], 96  }
  0x24   :  { %451 = vsyncadd [#allocation3], 4294967200 }
  0x25   :  { %452 = dma.done.wait [#allocation6], 4864  }
  0x26   :  { %453 = vsyncadd [#allocation6], 4294962432  ;;  %v460_v0 = vmov 0.0|0.0   ;;  %vm461_vm0 = vmmov 0   ;;  %v462_v1 = vmov 0.0   ;;  %v58_v2 = vld [vmem:[#allocation5 + $0x80] sm:$0xff]  ;;  %v92_v11 = vlaneseq }
  0x27   :  { %363 = vmatprep.subr.bf16.mxu1 %v460_v0  ;;  %328 = vmatprep.mubr.msk.f32.mxu1 %vm461_vm0, %v462_v1  ;;  %v59_v3 = vld [vmem:[#allocation5 + $0x88] sm:$0xff]  ;;  %v42_v4 = vld [vmem:[#allocation5] sm:$0xff]  ;;  %v60_v7 = vld [vmem:[#allocation5 + $0x90] sm:$0xff]  ;;  %v463_v9 = vmov 1983009808   ;;  %vm109_vm1 = vcmask 1043456  }
  0x28   :  { %v331_v5 = vpack.c.bf16 %v59_v3, %v58_v2  ;;  %v43_v6 = vld [vmem:[#allocation5 + $0x8] sm:$0xff]  ;;  %v61_v8 = vld [vmem:[#allocation5 + $0x98] sm:$0xff]  ;;  %v90_v10 = vunpack.c.l.s4 %v463_v9  ;;  %v44_v14 = vld [vmem:[#allocation5 + $0x10] sm:$0xff]  ;;  %v93_v23 = vshrl.u32 %v92_v11, 7  ;;  %vm464_vm2 = vmmov 1   ;;  %s465_s11 = smov [#allocation7]  }
  0x29   :  { %v333_v12 = vpack.c.bf16 %v43_v6, %v42_v4  ;;  %v335_v13 = vpack.c.bf16 %v61_v8, %v60_v7  ;;  %v45_v15 = vld [vmem:[#allocation5 + $0x18] sm:$0xff]  ;;  %v62_v16 = vld [vmem:[#allocation5 + $0xa0] sm:$0xff]  ;;  %v63_v17 = vld [vmem:[#allocation5 + $0xa8] sm:$0xff]  ;;  %vm106_vm4 = vcmask 359424   ;;  %s261_s12 = sshll.u32 %s465_s11, 4  ;;  %vm253_vm5 = vcmask 812032   ;;  %s262_s12 = int_to_ptr.vmem [resolvable:$true] %s261_s12 }
  0x2a   :  { %332 = vmatprep.subr.bf16.mxu0 %v331_v5  ;;  %v337_v18 = vpack.c.bf16 %v45_v15, %v44_v14  ;;  %v339_v19 = vpack.c.bf16 %v63_v17, %v62_v16  ;;  %v46_v20 = vld [vmem:[#allocation5 + $0x20] sm:$0xff]  ;;  %v47_v21 = vld [vmem:[#allocation5 + $0x28] sm:$0xff]  ;;  %v91_v22 = vunpack.c.0.s8 %v90_v10  ;;  %v64_v24 = vld [vmem:[#allocation5 + $0xb0] sm:$0xff]  ;;  %s428_s13 = scalar_lea.vmem %s262_s12, 32  ;;  %p433_p3 = scmp.lt.s32.totalorder %s262_s12, %s262_s12 }
  0x2b   :  { %334 = vmatpush3.bf16.msra.mxu0 %v333_v12  ;;  %v65_v25 = vld [vmem:[#allocation5 + $0xb8] sm:$0xff]  ;;  %v341_v26 = vpack.c.bf16 %v47_v21, %v46_v20  ;;  %v48_v27 = vld [vmem:[#allocation5 + $0x30] sm:$0xff]  ;;  %v74_v30 = vld [vmem:[#allocation5 + $0x100] sm:$0xff]  ;;  %p429_p2 = scmp.ne.s32.totalorder %s262_s12, %s428_s13  ;;  %p434_p4 = scmp.lt.s32.totalorder %s428_s13, %s428_s13 }
  0x2c   :  { %336 = vmatprep.subr.bf16.mxu0 %v335_v13  ;;  %v343_v28 = vpack.c.bf16 %v65_v25, %v64_v24  ;;  %v49_v29 = vld [vmem:[#allocation5 + $0x38] sm:$0xff]  ;;  %v75_v31 = vld [vmem:[#allocation5 + $0x108] sm:$0xff]  ;;  %v94_v32 = vsub.s32 %v91_v22, %v93_v23  ;;  %v66_v33 = vld [vmem:[#allocation5 + $0xc0] sm:$0xff] }
  0x2d   :  { %v67_v34 = vld [vmem:[#allocation5 + $0xc8] sm:$0xff]  ;;  %v364_v35 = vpack.c.bf16 %v75_v31, %v74_v30  ;;  %v76_v36 = vld [vmem:[#allocation5 + $0x110] sm:$0xff]  ;;  %v77_v37 = vld [vmem:[#allocation5 + $0x118] sm:$0xff]  ;;  %v345_v38 = vpack.c.bf16 %v49_v29, %v48_v27  ;;  %p435_p5 = por %p434_p4, %p433_p3 }
  0x2e   :  { %v50_v39 = vld [vmem:[#allocation5 + $0x40] sm:$0xff]  ;;  %v367_v40 = vpack.c.bf16 %v77_v37, %v76_v36  ;;  %v41_v41 = vld [vmem:[#allocation2] sm:$0x3f]  ;;  %v347_v42 = vpack.c.bf16 %v67_v34, %v66_v33  ;;  %v51_v43 = vld [vmem:[#allocation5 + $0x48] sm:$0xff] }
  0x2f   :  { %338 = vmatpush3.bf16.msra.mxu0 %v337_v18  ;;  %365 = vmatpush3.bf16.msra.mxu1 %v364_v35  ;;  %v95_v44 = vrot.slane %v41_v41, %v94_v32  ;;  %v78_v45 = vld [vmem:[#allocation5 + $0x120] sm:$0xff]  ;;  %v79_v46 = vld [vmem:[#allocation5 + $0x128] sm:$0xf]  ;;  %v68_v47 = vld [vmem:[#allocation5 + $0xd0] sm:$0xff]  ;;  %v88_v49 = vcombine.high %v41_v41, %v41_v41  ;;  %v349_v51 = vpack.c.bf16 %v51_v43, %v50_v39  ;;  %p436_p6 = pnand %p435_p5, %p429_p2 }
  0x30   :  { %340 = vmatprep.subr.bf16.mxu0 %v339_v19  ;;  %366 = vmatprep.subr.bf16.mxu1 %v460_v0  ;;  %v69_v48 = vld [vmem:[#allocation5 + $0xd8] sm:$0xff]  ;;  %v370_v52 = vpack.c.bf16 %v79_v46, %v78_v45  ;;  %v52_v54 = vld [vmem:[#allocation5 + $0x50] sm:$0xff]  ;;  %vm371_vm3 = vmpackc.low %vm109_vm1, %vm464_vm2 }
  0x31   :  { %v103_v50 = vcombine.high %v95_v44, %v95_v44  ;;  %v351_v53 = vpack.c.bf16 %v69_v48, %v68_v47  ;;  %v53_v55 = vld [vmem:[#allocation5 + $0x58] sm:$0xff]  ;;  %v70_v56 = vld [vmem:[#allocation5 + $0xe0] sm:$0xff]  ;;  %v71_v57 = vld [vmem:[#allocation5 + $0xe8] sm:$0xff]  ;;  %v102_v58 = vrot.slane %v88_v49, %v94_v32 }
  0x32   :  { %v353_v59 = vpack.c.bf16 %v53_v55, %v52_v54  ;;  %v355_v60 = vpack.c.bf16 %v71_v57, %v70_v56  ;;  %v54_v61 = vld [vmem:[#allocation5 + $0x60] sm:$0xff]  ;;  %v55_v62 = vld [vmem:[#allocation5 + $0x68] sm:$0xff]  ;;  %v72_v63 = vld [vmem:[#allocation5 + $0xf0] sm:$0xff] }
  0x33   :  { %342 = vmatpush3.bf16.msra.mxu0 %v341_v26  ;;  %368 = vmatpush3.bf16.msra.mxu1 %v367_v40  ;;  %v73_v1 = vld [vmem:[#allocation5 + $0xf8] sm:$0xff]  ;;  %v357_v2 = vpack.c.bf16 %v55_v62, %v54_v61  ;;  %v56_v4 = vld [vmem:[#allocation5 + $0x70] sm:$0xff] }
  0x34   :  { %344 = vmatprep.subr.bf16.mxu0 %v343_v28  ;;  %177 = vmatprep.mubr.f32.mxu0 %v103_v50  ;;  %v359_v3 = vpack.c.bf16 %v73_v1, %v72_v63  ;;  %v57_v5 = vld [vmem:[#allocation5 + $0x78] sm:$0xff] }
  0x35   :  { %369 = vmatprep.subr.bf16.mxu1 %v460_v0  ;;  %v361_v0 = vpack.c.bf16 %v57_v5, %v56_v4  ;;  %v271_v10 = vld [vmem:[%s537_s2] ss:$0 sm:$0xff] }
  0x37   :  { %346 = vmatpush3.bf16.msra.mxu0 %v345_v38  ;;  %372 = vmatpush3.bf16.msk.msra.mxu1 %vm371_vm3, %v370_v52 }
  0x38   :  { %348 = vmatprep.subr.bf16.mxu0 %v347_v42 }
  0x3a   :  { %329 = vmatmul.mubr.msk.f32.vlgmr.msra.gmra.mrb[0].mxu1 %vm106_vm4, %v102_v58 }
  0x3b   :  { %350 = vmatpush3.bf16.msra.mxu0 %v349_v51 }
  0x3c   :  { %352 = vmatprep.subr.bf16.mxu0 %v351_v53 }
  0x3f   :  { %354 = vmatpush3.bf16.msra.mxu0 %v353_v59 }
  0x40   :  { %356 = vmatprep.subr.bf16.mxu0 %v355_v60 }
  0x43   :  { %358 = vmatpush3.bf16.msra.mxu0 %v357_v2 }
  0x44   :  { %360 = vmatprep.subr.bf16.mxu0 %v359_v3 }
  0x47   :  { %362 = vmatpush3.bf16.msra.mxu0 %v361_v0 }
  0x4a   :  { %178 = vmatmul.mubr.f32.vlgmr.msra.gmra.mrb[0].mxu0 %v95_v44 }
 0x10d   :  { %v249_v6 = vpop.f32.mrb[0].mxu1 }
 0x10e   :  { %v330_v7 = vpop.f32.mrb[1].mxu1 }
 0x11d   :  { %v306_v8 = vpop.f32.mrb[0].mxu0 }
 0x11e   :  { %v307_v9 = vpop.f32.mrb[1].mxu0 }
 0x11f   :  { %v308_v11 = vadd.f32 %v307_v9, %v306_v8 }
 0x121   :  { %v180_v12 = vadd.f32 %v308_v11, %v271_v10 }
 0x123   :  { %v250_v13 = vadd.f32 %v249_v6, %v180_v12 }
 0x125   :  { %254 = vst.msk [vmem:[#allocation7] sm:$0x3] %vm253_vm5, %v250_v13 }
 0x126   :  { %439 = shalt.err (!%p436_p6)
}
 0x127   :  { %s440_s16 = scalar_lea.hbm %s538_s3, 32 }
 0x128   :  { %p441_p7 = scmp.ne.s32.totalorder %s538_s3, %s440_s16  ;;  %p444_p8 = scmp.lt.u32.totalorder %s440_s16, %s538_s3 }
 0x12a   :  { %p446_p9 = pnand %p444_p8, %p441_p7 }
 0x12c   :  { %449 = shalt.err (!%p446_p9)
}
 0x12d   :  { %264 = dma.vmem_to_hbm [thread:$0]  %s262_s12, 32, %s538_s3, [#allocation4]  }
 0x12e   :  { %454 = dma.done.wait [#allocation4], 32  }
 0x12f   :  { %455 = vsyncadd [#allocation4], 4294967264 }
 0x130   :  { %268 = vsyncpa [#allocation3], 1 }
 0x131   :  { %269 = vsyncpa [#allocation6], 1 }
 0x132   :  { %270 = vsyncpa [#allocation4], 1 }

</bundles_post_ra>
